<compile_context>
chip_gen: v7x
topology: tpu7x:2x2x1
jax: 0.10.0
libtpu: 0.0.40
codegen_flags: <defaults>
</compile_context>

<pallas_src>
import functools

import jax
import jax.numpy as jnp
from jax import lax
from jax.experimental import pallas as pl
from jax.experimental.pallas import tpu as pltpu


def _round_up(x, m):
    return ((x + m - 1) // m) * m


def _linear_t_kernel(w_ref, x_ref, b_ref, mean_t_ref):
    # w_ref: [O, K], x_ref: [TM, K], b_ref: [O, 1], mean_t_ref: [O, TM]
    # Contract over K (dim 1 of both operands) with W as the LHS so the result
    # is [O, TM]: the batch tile sits on the lane axis -> dense, unmasked stores.
    mean_t = lax.dot_general(
        w_ref[...],
        x_ref[...],
        dimension_numbers=(((1,), (1,)), ((), ())),
        preferred_element_type=jnp.float32,
    ) + b_ref[...]
    mean_t_ref[...] = mean_t.astype(mean_t_ref.dtype)


def _choose_batch_tile(B):
    """Pick (TM, num_tiles) for the batch grid."""
    if B <= 256:
        # Single tile whose block dims equal the full array dims: always legal,
        # no padding, no ragged tail. Small batches are latency-bound anyway.
        return B, 1
    # Multi-tile: TM must be a multiple of 128 (lane dim of the transposed
    # output block, sublane dim of the x block). Aim for >= 2 balanced tiles so
    # both v7x TensorCores get work; cap at 2048 so double-buffered x tiles
    # (2 * TM * K * 4 B = 16 MiB at K = 1024) fit comfortably in VMEM on every
    # generation (v7x: 64 MiB per TC, 32 MiB scoped limit below).
    tm = min(2048, _round_up(pl.cdiv(B, 2), 128))
    return tm, pl.cdiv(B, tm)


@functools.partial(jax.jit, static_argnames=("input_size",))
def gaussian_forward(x, w, b, logstd, *, input_size):
    """Gaussian.forward: returns (mean[B, O], std[O]) of the produced FixedNormal."""
    x_flat = x.reshape(-1, input_size)            # x.view(-1, input_size)
    B, K = x_flat.shape
    O = w.shape[0]

    TM, num_tiles = _choose_batch_tile(B)
    b_col = b.reshape(O, 1).astype(jnp.float32)

    cost = pl.CostEstimate(
        flops=2 * B * K * O,
        transcendentals=0,
        bytes_accessed=4 * (B * K + O * K + O * B + O),
    )

    mean_t = pl.pallas_call(
        _linear_t_kernel,
        out_shape=jax.ShapeDtypeStruct((O, B), jnp.float32),
        grid_spec=pltpu.PrefetchScalarGridSpec(
            num_scalar_prefetch=0,
            grid=(num_tiles,),
            in_specs=[
                pl.BlockSpec((O, K), lambda i: (0, 0)),    # weights resident in VMEM
                pl.BlockSpec((TM, K), lambda i: (i, 0)),   # x tile marches over batch
                pl.BlockSpec((O, 1), lambda i: (0, 0)),    # bias resident in VMEM
            ],
            out_specs=pl.BlockSpec((O, TM), lambda i: (0, i)),
        ),
        compiler_params=pltpu.CompilerParams(
            dimension_semantics=("parallel",),   # shard batch tiles across TCs on v7x
            vmem_limit_bytes=32 * 1024 * 1024,
        ),
        cost_estimate=cost,
    )(w, x_flat, b_col)

    mean = mean_t.T                               # tiny [O, B] -> [B, O]
    # scale = exp(action_logstd): batch-invariant; returned as the [O] vector so
    # no [B, O] broadcast is materialized at the jit boundary.
    std = jnp.exp(logstd.astype(jnp.float32))
    return mean, std


# --- FixedNormal method equivalents (plain JAX glue over kernel outputs) ---
def fixed_normal_log_probs(mean, std, actions):
    var = std * std
    log_scale = jnp.log(std)
    lp = -((actions - mean) ** 2) / (2.0 * var) - log_scale - 0.5 * jnp.log(2.0 * jnp.pi)
    return jnp.sum(lp, axis=-1, keepdims=True)


def fixed_normal_entropy(mean, std):
    ent = 0.5 + 0.5 * jnp.log(2.0 * jnp.pi) + jnp.log(std)
    return jnp.sum(jnp.broadcast_to(ent, mean.shape), axis=-1)


def fixed_normal_mode(mean, std):
    return mean


if __name__ == "__main__":
    # Module config (small, consistent with the PyTorch module)
    input_shape = (4, 16, 16)    # input_size = 1024
    output_shape = (8,)          # output_size = 8
    input_size = 4 * 16 * 16
    output_size = 8
    batch = 2

    key = jax.random.PRNGKey(0)
    k_x, k_w, k_logstd = jax.random.split(key, 3)

    # Deterministic parameter init mirroring __init__:
    #   orthogonal_(W, gain=calculate_gain('tanh')=5/3), constant_(b, 0), logstd ~ randn
    gain = 5.0 / 3.0
    w = jax.nn.initializers.orthogonal(scale=gain)(
        k_w, (output_size, input_size), jnp.float32
    )
    b = jnp.zeros((output_size,), jnp.float32)
    logstd = jax.random.normal(k_logstd, (output_size,), jnp.float32)

    # Example input: [B, C, H, W] (NCHW), flattened inside the wrapper
    x = jax.random.normal(k_x, (batch,) + input_shape, jnp.float32)

    mean, std = gaussian_forward(x, w, b, logstd, input_size=input_size)
    jax.block_until_ready((mean, std))

    # Reference check against plain JAX
    x_flat = x.reshape(-1, input_size)
    ref_mean = x_flat @ w.T + b
    ref_std = jnp.exp(logstd)
    assert mean.shape == (batch, output_size) and std.shape == (output_size,)
    assert jnp.allclose(mean, ref_mean, atol=1e-4, rtol=1e-4)
    assert jnp.allclose(std, ref_std, atol=1e-5, rtol=1e-5)

    # Exercise FixedNormal method equivalents (glue, not hot path); std [O]
    # broadcasts against mean [B, O] via normal jnp rules, mirroring torch Normal.
    actions = jax.random.normal(jax.random.PRNGKey(1), (batch, output_size), jnp.float32)
    _ = jax.block_until_ready(fixed_normal_log_probs(mean, std, actions))
    _ = jax.block_until_ready(fixed_normal_entropy(mean, std))
    _ = jax.block_until_ready(fixed_normal_mode(mean, std))

    print("KERNEL_OK")
</pallas_src>

<mosaic_0001>
module attributes {stable_mosaic.version = 11 : i64} {
  func.func @_linear_t_kernel(%arg0: i32, %arg1: memref<8x1024xf32, #tpu.memory_space<vmem>>, %arg2: memref<2x1024xf32, #tpu.memory_space<vmem>>, %arg3: memref<8x1xf32, #tpu.memory_space<vmem>>, %arg4: memref<8x2xf32, #tpu.memory_space<vmem>>) attributes {dimension_semantics = [#tpu.dimension_semantics<parallel>], iteration_bounds = array<i64: 1>, scalar_prefetch = 0 : i64, scratch_operands = 0 : i64, tpu.core_type = #tpu.core_type<tc>, window_params = [{pipeline_mode = #tpu.pipeline_mode<synchronous>, transform_indices = @transform_0, window_bounds = array<i64: 8, 1024>}, {transform_indices = @transform_1, window_bounds = array<i64: 2, 1024>}, {pipeline_mode = #tpu.pipeline_mode<synchronous>, transform_indices = @transform_2, window_bounds = array<i64: 8, 1>}, {transform_indices = @transform_3, window_bounds = array<i64: 8, 2>}]} {
    %c0 = arith.constant 0 : index
    %c0_0 = arith.constant 0 : index
    %0 = vector.load %arg1[%c0, %c0_0] : memref<8x1024xf32, #tpu.memory_space<vmem>>, vector<8x1024xf32>
    %c0_1 = arith.constant 0 : index
    %c0_2 = arith.constant 0 : index
    %1 = vector.load %arg2[%c0_1, %c0_2] : memref<2x1024xf32, #tpu.memory_space<vmem>>, vector<2x1024xf32>
    %cst = arith.constant dense<0.000000e+00> : vector<8x2xf32>
    %2 = tpu.matmul %0, %1, %cst {dimension_numbers = #tpu.dot_dimension_numbers<[1], [1], [0], [0], [0, 0, 1, 0], [], []>} : vector<8x1024xf32>, vector<2x1024xf32>, vector<8x2xf32> -> vector<8x2xf32>
    %c0_3 = arith.constant 0 : index
    %c0_4 = arith.constant 0 : index
    %3 = vector.load %arg3[%c0_3, %c0_4] : memref<8x1xf32, #tpu.memory_space<vmem>>, vector<8x1xf32>
    %4 = vector.broadcast %3 : vector<8x1xf32> to vector<8x2xf32>
    %5 = arith.addf %2, %4 : vector<8x2xf32>
    %c0_5 = arith.constant 0 : index
    %c0_6 = arith.constant 0 : index
    %6 = vector.load %arg4[%c0_5, %c0_6] : memref<8x2xf32, #tpu.memory_space<vmem>>, vector<8x2xf32>
    tpu.vector_store %arg4[%c0_5, %c0_6], %5 {strides = array<i32>} : memref<8x2xf32, #tpu.memory_space<vmem>>, vector<8x2xf32>,
    return
  }
  func.func @transform_0(%arg0: i32) -> (i32, i32) {
    %c0_i32 = arith.constant 0 : i32
    %c0_i32_0 = arith.constant 0 : i32
    %c0_i32_1 = arith.constant 0 : i32
    return %c0_i32, %c0_i32_0 : i32, i32
  }
  func.func @transform_1(%arg0: i32) -> (i32, i32) {
    %c0_i32 = arith.constant 0 : i32
    %c0_i32_0 = arith.constant 0 : i32
    return %arg0, %c0_i32 : i32, i32
  }
  func.func @transform_2(%arg0: i32) -> (i32, i32) {
    %c0_i32 = arith.constant 0 : i32
    %c0_i32_0 = arith.constant 0 : i32
    %c0_i32_1 = arith.constant 0 : i32
    return %c0_i32, %c0_i32_0 : i32, i32
  }
  func.func @transform_3(%arg0: i32) -> (i32, i32) {
    %c0_i32 = arith.constant 0 : i32
    %c0_i32_0 = arith.constant 0 : i32
    return %c0_i32, %arg0 : i32, i32
  }
}

</mosaic_0001>

<bundles_post_ra>
// kernel: gaussian_forward.1
= control target key start
LH: loop header
LB: loop body
LE: loop exit
PB: predicated region body
PF: predicated region fallthrough
CT: control target
= control target key end

     0   :  { %v36_v0 = vlaneseq  ;;  %v371_v1 = vmov 1983009808   ;;  %v372_v4 = vmov 0   ;;  %vm354_vm0 = vcmask 15360   ;;  %s429_s1 = inlined_call_operand.vmem [shape: f32[2,1024], index: 1, kind: input, shape index: {}]   ;;  %s430_s0 = inlined_call_operand.vmem [shape: f32[8,1024], index: 0, kind: input, shape index: {}]   ;;  %s431_s2 = inlined_call_operand.vmem [shape: f32[8,1], index: 2, kind: input, shape index: {}]   ;;  %s432_s3 = inlined_call_operand.vmem [shape: f32[8,2], index: 3, kind: output, shape index: {}]  }
   0x1   :  { %v34_v2 = vunpack.c.l.s4 %v371_v1  ;;  %v15_v3 = vld [vmem:[%s430_s0 + $0x8] sm:$0xff]  ;;  %368 = vset.pattern.permute.xlu0 %v372_v4  ;;  %v22_v5 = vld [vmem:[%s429_s1] sm:$0xff]  ;;  %v17_v24 = vld [vmem:[%s430_s0 + $0x18] sm:$0xff] }
   0x2   :  { %v37_v6 = vshrl.u32 %v36_v0, 7  ;;  %v23_v7 = vld [vmem:[%s429_s1 + $0x8] sm:$0xff]  ;;  %138 = vmatprep.mubr.f32.mxu1 %v15_v3  ;;  %v32_v9 = vcombine.high %v22_v5, %v22_v5  ;;  %v24_v12 = vld [vmem:[%s431_s2] sm:$0xff]  ;;  %v21_v25 = vld [vmem:[%s430_s0 + $0x38] sm:$0xff] }
   0x3   :  { %v19_v8 = vld [vmem:[%s430_s0 + $0x28] sm:$0xff]  ;;  %v35_v10 = vunpack.c.0.s8 %v34_v2  ;;  %v49_v11 = vcombine.high %v23_v7, %v23_v7  ;;  %27 = vperm.xlu0 %368, %v24_v12   ;;  %v14_v22 = vld [vmem:[%s430_s0] sm:$0xff]  ;;  %v16_v26 = vld [vmem:[%s430_s0 + $0x10] sm:$0xff] }
   0x4   :  { %278 = vmatprep.mubr.f32.mxu0 %v19_v8  ;;  %v18_v23 = vld [vmem:[%s430_s0 + $0x20] sm:$0xff]  ;;  %v20_v27 = vld [vmem:[%s430_s0 + $0x30] sm:$0xff] }
   0x5   :  { %v38_v13 = vsub.s32 %v35_v10, %v37_v6 }
   0x7   :  { %v39_v14 = vrot.slane %v22_v5, %v38_v13  ;;  %v56_v15 = vrot.slane %v23_v7, %v38_v13  ;;  %v46_v16 = vrot.slane %v32_v9, %v38_v13  ;;  %v63_v17 = vrot.slane %v49_v11, %v38_v13 }
   0x9   :  { %v47_v18 = vcombine.high %v39_v14, %v39_v14  ;;  %v64_v19 = vcombine.high %v56_v15, %v56_v15  ;;  %v48_v20 = vcombine.high %v46_v16, %v46_v16  ;;  %v65_v21 = vcombine.high %v63_v17, %v63_v17 }
   0xb   :  { %74 = vmatprep.subr.mxu1 %v47_v18  ;;  %214 = vmatprep.subr.mxu0 %v64_v19 }
   0xc   :  { %75 = vmatpush1.xpose.msra.mxu1 %v39_v14  ;;  %215 = vmatpush1.xpose.msra.mxu0 %v56_v15 }
   0xd   :  { %144 = vmatprep.subr.mxu1 %v48_v20  ;;  %284 = vmatprep.subr.mxu0 %v65_v21 }
   0xf   :  { %139 = vmatmul.mubr.f32.vlgmr.msra.gmra.mrb[0].mxu1 %v14_v22  ;;  %279 = vmatmul.mubr.f32.vlgmr.msra.gmra.mrb[0].mxu0 %v18_v23 }
  0x10   :  { %145 = vmatpush1.xpose.msra.mxu1 %v46_v16  ;;  %285 = vmatpush1.xpose.msra.mxu0 %v63_v17 }
  0x11   :  { %208 = vmatprep.mubr.f32.mxu1 %v17_v24  ;;  %348 = vmatprep.mubr.f32.mxu0 %v21_v25 }
  0x17   :  { %209 = vmatmul.mubr.f32.vlgmr.msra.gmra.mrb[0].mxu1 %v16_v26  ;;  %349 = vmatmul.mubr.f32.vlgmr.msra.gmra.mrb[0].mxu0 %v20_v27 }
  0x82   :  { %v28_v28 = vpop.permute.xlu0 %27 }
  0xea   :  { %v210_v29 = vpop.f32.mrb[0].mxu1  ;;  %v350_v30 = vpop.f32.mrb[0].mxu0 }
  0xeb   :  { %v360_v31 = vadd.f32 %v210_v29, %v28_v28  ;;  %v212_v32 = vpop.f32.mrb[1].mxu1  ;;  %v352_v33 = vpop.f32.mrb[1].mxu0 }
  0xed   :  { %v361_v34 = vadd.f32 %v360_v31, %v350_v30 }
  0xef   :  { %355 = vst.msk [vmem:[%s432_s3] sm:$0xff] %vm354_vm0, %v361_v34 }

</bundles_post_ra>
